<compile_context>
chip_gen: v5e
topology: v5e:2x2
jax: 0.10.0
libtpu: 0.0.40
codegen_flags: <defaults>
</compile_context>

<pallas_src>
import jax
import jax.numpy as jnp
from jax.experimental import pallas as pl
from jax.experimental.pallas import tpu as pltpu


def _time_feature_embed_kernel(x_ref, w_ref, o_ref):
    # x_ref: (TM, d_inp), w_ref: (d_inp, d_model), o_ref: (TM, d_model)
    # K is tiny; MXU pads it internally.  Accumulate in f32, cast on store.
    o_ref[...] = jnp.dot(
        x_ref[...], w_ref[...], preferred_element_type=jnp.float32
    ).astype(o_ref.dtype)


def _round_up(x, m):
    return ((x + m - 1) // m) * m


def _choose_row_tile(m, d_model, itemsize):
    # VMEM accounting (double-buffered):
    #   out  block: 2 * TM * round_up(d_model, 128) * itemsize
    #   x    block: 2 * TM * 128 * itemsize   (tiny d_inp last dim pads to a full
    #                                          128-lane tile in VMEM)
    #   weight    : negligible (d_inp <= 6 rows)
    # Keep the total under ~24 MiB so it fits every generation's scoped VMEM
    # (we raise the limit to 32 MiB via CompilerParams below).
    lanes_out = _round_up(d_model, 128)
    budget_bytes = 24 * 1024 * 1024
    per_row_bytes = 2 * (lanes_out + 128) * itemsize
    tm = budget_bytes // per_row_bytes
    tm = max(8, min(8192, (tm // 8) * 8))
    # Keep at least 2 grid steps when there is enough work, so v7x can shard
    # the row tiles across its two TensorCores.
    if m > 16:
        tm = min(tm, _round_up(pl.cdiv(m, 2), 8))
    # Never exceed (rounded-up) problem size.
    tm = min(tm, _round_up(m, 8))
    return tm


def time_feature_embedding(x, weight):
    """x: (B, L, d_inp); weight: (d_inp, d_model), i.e. W^T of PyTorch's
    nn.Linear(d_inp, d_model, bias=False) parameter. Returns (B, L, d_model)."""
    B, L, d_inp = x.shape
    assert weight.shape[0] == d_inp
    d_model = weight.shape[1]
    M = B * L

    itemsize = jnp.dtype(x.dtype).itemsize
    TM = _choose_row_tile(M, d_model, itemsize)
    num_tiles = pl.cdiv(M, TM)  # ragged edge block is masked by Pallas

    x_flat = x.reshape(M, d_inp)

    cost = pl.CostEstimate(
        flops=2 * M * d_inp * d_model,
        transcendentals=0,
        bytes_accessed=(M * d_inp + d_inp * d_model + M * d_model) * itemsize,
    )

    out_flat = pl.pallas_call(
        _time_feature_embed_kernel,
        out_shape=jax.ShapeDtypeStruct((M, d_model), x.dtype),
        grid_spec=pltpu.PrefetchScalarGridSpec(
            num_scalar_prefetch=0,
            grid=(num_tiles,),
            in_specs=[
                # Row tile of x marches along the grid (last dim = full extent).
                pl.BlockSpec((TM, d_inp), lambda i: (i, 0)),
                # Weight is tiny: DMA'd once, stays resident across grid steps.
                pl.BlockSpec((d_inp, d_model), lambda i: (0, 0)),
            ],
            out_specs=pl.BlockSpec((TM, d_model), lambda i: (i, 0)),
        ),
        compiler_params=pltpu.CompilerParams(
            # Independent row tiles -> let v7x shard across its 2 TensorCores.
            dimension_semantics=("parallel",),
            # Large tiles need more than v5e's 16 MiB scoped default; 32 MiB is
            # safe on every generation (<= physical per-TC VMEM everywhere).
            vmem_limit_bytes=32 * 1024 * 1024,
        ),
        cost_estimate=cost,
    )(x_flat, weight)

    # Pure metadata reshape (no data movement), no de-pad slice needed.
    return out_flat.reshape(B, L, d_model)


if __name__ == "__main__":
    # Module config: freq='h' -> d_inp = 4; small d_model for the demo.
    d_inp = 4
    d_model = 32
    B, L = 2, 8

    key = jax.random.PRNGKey(0)
    k_x, k_w = jax.random.split(key)

    x = jax.random.normal(k_x, (B, L, d_inp), dtype=jnp.float32)
    # Deterministic synthetic Linear weight, stored as (d_inp, d_model)
    # (transposed relative to PyTorch's (d_model, d_inp) parameter).
    bound = 1.0 / jnp.sqrt(jnp.float32(d_inp))
    weight = jax.random.uniform(
        k_w, (d_inp, d_model), dtype=jnp.float32, minval=-bound, maxval=bound
    )

    out = time_feature_embedding(x, weight)
    out = jax.block_until_ready(out)

    # Reference check against plain JAX (same semantics as PyTorch x @ W.T, bias-free).
    ref = x @ weight
    assert out.shape == (B, L, d_model)
    assert jnp.allclose(out, ref, atol=1e-5, rtol=1e-5)

    print("KERNEL_OK")
</pallas_src>

<mosaic_0001>
module attributes {stable_mosaic.version = 11 : i64} {
  func.func @_time_feature_embed_kernel(%arg0: i32, %arg1: memref<16x4xf32, #tpu.memory_space<vmem>>, %arg2: memref<4x32xf32, #tpu.memory_space<vmem>>, %arg3: memref<16x32xf32, #tpu.memory_space<vmem>>) attributes {dimension_semantics = [#tpu.dimension_semantics<parallel>], iteration_bounds = array<i64: 1>, scalar_prefetch = 0 : i64, scratch_operands = 0 : i64, tpu.core_type = #tpu.core_type<tc>, window_params = [{transform_indices = @transform_0, window_bounds = array<i64: 16, 4>}, {pipeline_mode = #tpu.pipeline_mode<synchronous>, transform_indices = @transform_1, window_bounds = array<i64: 4, 32>}, {transform_indices = @transform_2, window_bounds = array<i64: 16, 32>}]} {
    %c0 = arith.constant 0 : index
    %c0_0 = arith.constant 0 : index
    %0 = vector.load %arg1[%c0, %c0_0] : memref<16x4xf32, #tpu.memory_space<vmem>>, vector<16x4xf32>
    %c0_1 = arith.constant 0 : index
    %c0_2 = arith.constant 0 : index
    %1 = vector.load %arg2[%c0_1, %c0_2] : memref<4x32xf32, #tpu.memory_space<vmem>>, vector<4x32xf32>
    %cst = arith.constant dense<0.000000e+00> : vector<16x32xf32>
    %2 = tpu.matmul %0, %1, %cst {dimension_numbers = #tpu.dot_dimension_numbers<[1], [0], [0], [1], [0, 0, 1, 1], [], []>} : vector<16x4xf32>, vector<4x32xf32>, vector<16x32xf32> -> vector<16x32xf32>
    %c0_3 = arith.constant 0 : index
    %c0_4 = arith.constant 0 : index
    %3 = vector.load %arg3[%c0_3, %c0_4] : memref<16x32xf32, #tpu.memory_space<vmem>>, vector<16x32xf32>
    tpu.vector_store %arg3[%c0_3, %c0_4], %2 {strides = array<i32>} : memref<16x32xf32, #tpu.memory_space<vmem>>, vector<16x32xf32>,
    return
  }
  func.func @transform_0(%arg0: i32) -> (i32, i32) {
    %c0_i32 = arith.constant 0 : i32
    %c0_i32_0 = arith.constant 0 : i32
    return %arg0, %c0_i32 : i32, i32
  }
  func.func @transform_1(%arg0: i32) -> (i32, i32) {
    %c0_i32 = arith.constant 0 : i32
    %c0_i32_0 = arith.constant 0 : i32
    %c0_i32_1 = arith.constant 0 : i32
    return %c0_i32, %c0_i32_0 : i32, i32
  }
  func.func @transform_2(%arg0: i32) -> (i32, i32) {
    %c0_i32 = arith.constant 0 : i32
    %c0_i32_0 = arith.constant 0 : i32
    return %arg0, %c0_i32 : i32, i32
  }
}

</mosaic_0001>

<bundles_post_ra>
// kernel: tpu_custom_call.1
= control target key start
LH: loop header
LB: loop body
LE: loop exit
PB: predicated region body
PF: predicated region fallthrough
CT: control target
= control target key end

     0   :  { %vm22_vm0 = vcmask 1043456   ;;  %vm15_vm1 = vcmask 31744   ;;  %s133_s0 = inlined_call_operand.vmem [shape: f32[16,4], index: 0, kind: input, shape index: {}]   ;;  %s134_s1 = inlined_call_operand.vmem [shape: f32[4,32], index: 1, kind: input, shape index: {}]   ;;  %s135_s2 = inlined_call_operand.hbm [shape: f32[16,32], index: 2, kind: output, shape index: {}]  }
   0x1   :  { %v14_v0 = vld [vmem:[%s134_s1] sm:$0xf]  ;;  %v13_v2 = vld [vmem:[%s133_s0 + $0x8] sm:$0xff] }
   0x2   :  { %v12_v1 = vld [vmem:[%s133_s0] sm:$0xff]  ;;  %70 = vmatpush.msk.msra.mxu0 %vm22_vm0, %v14_v0  ;;  %73 = vmatpush.msk.msra.mxu1 %vm22_vm0, %v14_v0 }
   0x3   :  { %7 = vsyncpa [#allocation3], 0  ;;  %71 = vmatmul.msk.f32.vlgmr.msra.gmra.mxu0 %vm15_vm1, %v12_v1  ;;  %72 = vmatmul.msk.f32.vlgmr.msra.gmra.mxu1 %vm15_vm1, %v13_v2  ;;  %s103_s15 = smov [#allocation2]   ;;  %s58_s1 = sshll.u32 %s135_s2, 4  ;;  %vm49_vm2 = vcmask 261120   ;;  %s59_s1 = int_to_ptr.hbm [resolvable:$true] %s58_s1 }
   0x4   :  { %s56_s16 = sshll.u32 %s103_s15, 4  ;;  %s104_s19 = smov 128   ;;  %s57_s16 = int_to_ptr.vmem [resolvable:$true] %s56_s16 }
   0x5   :  { %s105_s0 = smov 8  }
  0x80   :  { %v43_v3 = vpop.f32.mrf.mxu0  ;;  %v46_v4 = vpop.f32.mrf.mxu1 }
  0x81   :  { %50 = vst.msk [vmem:[#allocation2] sm:$0xff] %vm49_vm2, %v43_v3 }
  0x82   :  { %51 = vst.msk [vmem:[#allocation2 + $0x8] sm:$0xff] %vm49_vm2, %v46_v4 }
  0x83   :  { %64 = dma.vmem_to_hbm [thread:$0]  %s57_s16, 256, %s59_s1, [#allocation3], %s104_s19, %s104_s19, %s105_s0  }
  0x84   :  { %101 = dma.done.wait [#allocation3], 256  }
  0x85   :  { %102 = vsyncadd [#allocation3], 4294967040 }
  0x86   :  { %69 = vsyncpa [#allocation3], 1 }

</bundles_post_ra>
